<compile_context>
chip_gen: v7x
topology: tpu7x:2x2x1
jax: 0.10.0
libtpu: 0.0.40
codegen_flags: <defaults>
</compile_context>

<pallas_src>
import functools

import jax
import jax.numpy as jnp
from jax import lax
from jax.experimental import pallas as pl
from jax.experimental.pallas import tpu as pltpu


def _discriminator_kernel(x_ref, w_ref, b_ref, o_ref, *, dim_h, n_z):
    """Whole 5-layer MLP for one lane-dense batch tile.

    x_ref: (tile_b, n_z)              natural layout, contracted on its last dim
    w_ref: (5*dim_h, max(n_z, dim_h)) packed weight slab (compute dtype)
    b_ref: (4*dim_h + 1, 1)           packed f32 bias slab (last row = b5)
    o_ref: (1, tile_b)                lane-dense critic scores
    """
    H = dim_h
    wdt = w_ref.dtype

    # Static, sublane-aligned slices of the packed parameter slabs.
    w1 = w_ref[0 * H:1 * H, 0:n_z]       # (H, n_z)
    w2 = w_ref[1 * H:2 * H, 0:H]         # (H, H)
    w3 = w_ref[2 * H:3 * H, 0:H]
    w4 = w_ref[3 * H:4 * H, 0:H]
    w5 = w_ref[4 * H:5 * H, 0:1]         # (H, 1) final-layer column
    b1 = b_ref[0 * H:1 * H, :]           # (H, 1)
    b2 = b_ref[1 * H:2 * H, :]
    b3 = b_ref[2 * H:3 * H, :]
    b4 = b_ref[3 * H:4 * H, :]
    b5 = b_ref[4 * H:4 * H + 1, :]       # (1, 1)

    # Layer 1: contract over n_z on both operands -> (H, tile_b), batch on lanes.
    h = lax.dot_general(w1, x_ref[...].astype(wdt),
                        (((1,), (1,)), ((), ())),
                        preferred_element_type=jnp.float32) + b1
    h = jnp.maximum(h, 0.0)              # f32 epilogue (v5e-friendly)

    h = jnp.dot(w2, h.astype(wdt), preferred_element_type=jnp.float32) + b2
    h = jnp.maximum(h, 0.0)
    h = jnp.dot(w3, h.astype(wdt), preferred_element_type=jnp.float32) + b3
    h = jnp.maximum(h, 0.0)
    h = jnp.dot(w4, h.astype(wdt), preferred_element_type=jnp.float32) + b4
    h = jnp.maximum(h, 0.0)

    # Final Linear(H, 1): VPU multiply + sublane reduce (XLU), then bias.
    out = jnp.sum(h * w5.astype(jnp.float32), axis=0, keepdims=True) + b5
    o_ref[...] = out.astype(o_ref.dtype)


def discriminator_forward(x, params, *, tile_b=512, compute_dtype=jnp.float32):
    """x: (B, n_z). params: (w1,b1,...,w5,b5) with weights in PyTorch (out, in)
    layout, the final weight stored as a (dim_h, 1) column, biases as (out, 1)
    columns.  Returns (B, 1) critic scores in x.dtype."""
    B, n_z = x.shape
    w1, b1, w2, b2, w3, b3, w4, b4, w5, b5 = params
    dim_h = w1.shape[0]

    # ---- batch tiling --------------------------------------------------------
    # Lane-aligned tile, capped at 1024 (vreg pressure), then clamped so the
    # grid has >= 2 steps whenever the batch allows it (v7x megacore).
    tile_b = max(128, min((tile_b // 128) * 128, 1024))
    half_b = ((((B + 1) // 2) + 127) // 128) * 128
    tile_b = min(tile_b, max(128, half_b))
    Bp = ((B + tile_b - 1) // tile_b) * tile_b
    xq = x if Bp == B else jnp.pad(x, ((0, Bp - B), (0, 0)))    # rows only

    # ---- pack the 10 params into 2 grid-invariant slabs ----------------------
    W = max(n_z, dim_h)
    pad_c = lambda w: jnp.pad(w, ((0, 0), (0, W - w.shape[1])))
    w_slab = jnp.concatenate(
        [pad_c(w1), pad_c(w2), pad_c(w3), pad_c(w4), pad_c(w5)],
        axis=0).astype(compute_dtype)                            # (5*dim_h, W)
    b_slab = jnp.concatenate([b1, b2, b3, b4, b5],
                             axis=0).astype(jnp.float32)         # (4*dim_h+1, 1)

    grid = (Bp // tile_b,)
    # Constant-index param blocks: Pallas skips re-DMA when the block index is
    # unchanged across grid steps, so both slabs are fetched from HBM once.
    in_specs = [
        pl.BlockSpec((tile_b, n_z), lambda i: (i, 0)),
        pl.BlockSpec(w_slab.shape, lambda i: (0, 0)),
        pl.BlockSpec(b_slab.shape, lambda i: (0, 0)),
    ]
    out_spec = pl.BlockSpec((1, tile_b), lambda i: (0, i))

    flops = 2 * Bp * (n_z * dim_h + 3 * dim_h * dim_h + dim_h)
    nbytes = lambda a: int(a.size) * a.dtype.itemsize
    cost = pl.CostEstimate(
        flops=int(flops), transcendentals=0,
        bytes_accessed=int(nbytes(xq) + nbytes(w_slab) + nbytes(b_slab) + Bp * 4))

    out_t = pl.pallas_call(
        functools.partial(_discriminator_kernel, dim_h=dim_h, n_z=n_z),
        out_shape=jax.ShapeDtypeStruct((1, Bp), jnp.float32),
        grid_spec=pltpu.PrefetchScalarGridSpec(
            num_scalar_prefetch=0,
            grid=grid,
            in_specs=in_specs,
            out_specs=out_spec,
        ),
        compiler_params=pltpu.CompilerParams(
            dimension_semantics=("parallel",)),
        cost_estimate=cost,
    )(xq, w_slab, b_slab)

    return jnp.transpose(out_t)[:B].astype(x.dtype)              # (B, 1)


def init_params(key, n_z, dim_h):
    """PyTorch-Linear-style uniform(-1/sqrt(fan_in), 1/sqrt(fan_in)).
    Weights stored (out, in); final weight kept as a (dim_h, 1) column for the
    in-kernel VPU reduce; biases stored as (out, 1) columns."""
    dims = [(dim_h, n_z), (dim_h, dim_h), (dim_h, dim_h), (dim_h, dim_h), (1, dim_h)]
    params = []
    for li, (fan_out, fan_in) in enumerate(dims):
        key, kw, kb = jax.random.split(key, 3)
        bound = 1.0 / jnp.sqrt(float(fan_in))
        w = jax.random.uniform(kw, (fan_out, fan_in), jnp.float32, -bound, bound)
        b = jax.random.uniform(kb, (fan_out, 1), jnp.float32, -bound, bound)
        if li == 4:
            w = jnp.transpose(w)                                 # (dim_h, 1)
        params += [w, b]
    return tuple(params)


def reference_forward(x, params):
    """Plain-JAX reference of the same MLP for correctness checks."""
    w1, b1, w2, b2, w3, b3, w4, b4, w5, b5 = params
    h = jnp.maximum(x @ w1.T + b1.T, 0.0)
    h = jnp.maximum(h @ w2.T + b2.T, 0.0)
    h = jnp.maximum(h @ w3.T + b3.T, 0.0)
    h = jnp.maximum(h @ w4.T + b4.T, 0.0)
    return h @ w5 + b5.T


if __name__ == "__main__":
    n_z, dim_h = 8, 32
    key = jax.random.PRNGKey(0)
    key_x, key_p, key_x2 = jax.random.split(key, 3)
    params = init_params(key_p, n_z, dim_h)

    # 1) f32 path, ragged batch (240 -> two 128-lane tiles, exercises padding).
    x = jax.random.normal(key_x, (240, n_z), dtype=jnp.float32)
    out = jax.block_until_ready(discriminator_forward(x, params))
    ref = reference_forward(x, params)
    assert out.shape == (240, 1)
    assert jnp.allclose(out, ref, atol=1e-5, rtol=1e-5), "f32 mismatch vs reference"

    # 2) bf16-weight path, batch 1024 -> two 512-lane tiles (larger tile,
    #    no padding, both v7x TensorCores busy). Looser tolerance for bf16.
    x2 = jax.random.normal(key_x2, (1024, n_z), dtype=jnp.float32)
    out2 = jax.block_until_ready(
        discriminator_forward(x2, params, compute_dtype=jnp.bfloat16))
    ref2 = reference_forward(x2, params)
    assert out2.shape == (1024, 1)
    assert jnp.allclose(out2, ref2, atol=5e-2, rtol=5e-2), "bf16 mismatch vs reference"

    print("KERNEL_OK")
</pallas_src>

<mosaic_0001>
module attributes {stable_mosaic.version = 11 : i64} {
  func.func @_discriminator_kernel(%arg0: i32, %arg1: memref<128x8xf32, #tpu.memory_space<vmem>>, %arg2: memref<160x32xf32, #tpu.memory_space<vmem>>, %arg3: memref<129x1xf32, #tpu.memory_space<vmem>>, %arg4: memref<1x128xf32, #tpu.memory_space<vmem>>) attributes {dimension_semantics = [#tpu.dimension_semantics<parallel>], iteration_bounds = array<i64: 2>, scalar_prefetch = 0 : i64, scratch_operands = 0 : i64, tpu.core_type = #tpu.core_type<tc>, window_params = [{transform_indices = @transform_0, window_bounds = array<i64: 128, 8>}, {pipeline_mode = #tpu.pipeline_mode<synchronous>, transform_indices = @transform_1, window_bounds = array<i64: 160, 32>}, {pipeline_mode = #tpu.pipeline_mode<synchronous>, transform_indices = @transform_2, window_bounds = array<i64: 129, 1>}, {transform_indices = @transform_3, window_bounds = array<i64: 1, 128>}]} {
    %c0 = arith.constant 0 : index
    %c0_0 = arith.constant 0 : index
    %0 = vector.load %arg2[%c0, %c0_0] : memref<160x32xf32, #tpu.memory_space<vmem>>, vector<32x8xf32>
    %c32 = arith.constant 32 : index
    %c0_1 = arith.constant 0 : index
    %1 = vector.load %arg2[%c32, %c0_1] : memref<160x32xf32, #tpu.memory_space<vmem>>, vector<32x32xf32>
    %c64 = arith.constant 64 : index
    %c0_2 = arith.constant 0 : index
    %2 = vector.load %arg2[%c64, %c0_2] : memref<160x32xf32, #tpu.memory_space<vmem>>, vector<32x32xf32>
    %c96 = arith.constant 96 : index
    %c0_3 = arith.constant 0 : index
    %3 = vector.load %arg2[%c96, %c0_3] : memref<160x32xf32, #tpu.memory_space<vmem>>, vector<32x32xf32>
    %c128 = arith.constant 128 : index
    %c0_4 = arith.constant 0 : index
    %4 = vector.load %arg2[%c128, %c0_4] : memref<160x32xf32, #tpu.memory_space<vmem>>, vector<32x1xf32>
    %c0_5 = arith.constant 0 : index
    %c0_6 = arith.constant 0 : index
    %5 = vector.load %arg3[%c0_5, %c0_6] : memref<129x1xf32, #tpu.memory_space<vmem>>, vector<32x1xf32>
    %c32_7 = arith.constant 32 : index
    %c0_8 = arith.constant 0 : index
    %6 = vector.load %arg3[%c32_7, %c0_8] : memref<129x1xf32, #tpu.memory_space<vmem>>, vector<32x1xf32>
    %c64_9 = arith.constant 64 : index
    %c0_10 = arith.constant 0 : index
    %7 = vector.load %arg3[%c64_9, %c0_10] : memref<129x1xf32, #tpu.memory_space<vmem>>, vector<32x1xf32>
    %c96_11 = arith.constant 96 : index
    %c0_12 = arith.constant 0 : index
    %8 = vector.load %arg3[%c96_11, %c0_12] : memref<129x1xf32, #tpu.memory_space<vmem>>, vector<32x1xf32>
    %c128_13 = arith.constant 128 : index
    %c0_14 = arith.constant 0 : index
    %9 = vector.load %arg3[%c128_13, %c0_14] : memref<129x1xf32, #tpu.memory_space<vmem>>, vector<1x1xf32>
    %c0_15 = arith.constant 0 : index
    %c0_16 = arith.constant 0 : index
    %10 = vector.load %arg1[%c0_15, %c0_16] : memref<128x8xf32, #tpu.memory_space<vmem>>, vector<128x8xf32>
    %cst = arith.constant dense<0.000000e+00> : vector<32x128xf32>
    %11 = tpu.matmul %0, %10, %cst {dimension_numbers = #tpu.dot_dimension_numbers<[1], [1], [0], [0], [0, 0, 1, 0], [], []>} : vector<32x8xf32>, vector<128x8xf32>, vector<32x128xf32> -> vector<32x128xf32>
    %12 = vector.broadcast %5 : vector<32x1xf32> to vector<32x128xf32>
    %13 = arith.addf %11, %12 : vector<32x128xf32>
    %cst_17 = arith.constant 0.000000e+00 : f32
    %14 = vector.broadcast %cst_17 : f32 to vector<32x128xf32>
    %15 = arith.maximumf %13, %14 : vector<32x128xf32>
    %cst_18 = arith.constant dense<0.000000e+00> : vector<32x128xf32>
    %16 = tpu.matmul %1, %15, %cst_18 {dimension_numbers = #tpu.dot_dimension_numbers<[1], [0], [0], [1], [0, 0, 1, 1], [], []>} : vector<32x32xf32>, vector<32x128xf32>, vector<32x128xf32> -> vector<32x128xf32>
    %17 = vector.broadcast %6 : vector<32x1xf32> to vector<32x128xf32>
    %18 = arith.addf %16, %17 : vector<32x128xf32>
    %cst_19 = arith.constant 0.000000e+00 : f32
    %19 = vector.broadcast %cst_19 : f32 to vector<32x128xf32>
    %20 = arith.maximumf %18, %19 : vector<32x128xf32>
    %cst_20 = arith.constant dense<0.000000e+00> : vector<32x128xf32>
    %21 = tpu.matmul %2, %20, %cst_20 {dimension_numbers = #tpu.dot_dimension_numbers<[1], [0], [0], [1], [0, 0, 1, 1], [], []>} : vector<32x32xf32>, vector<32x128xf32>, vector<32x128xf32> -> vector<32x128xf32>
    %22 = vector.broadcast %7 : vector<32x1xf32> to vector<32x128xf32>
    %23 = arith.addf %21, %22 : vector<32x128xf32>
    %cst_21 = arith.constant 0.000000e+00 : f32
    %24 = vector.broadcast %cst_21 : f32 to vector<32x128xf32>
    %25 = arith.maximumf %23, %24 : vector<32x128xf32>
    %cst_22 = arith.constant dense<0.000000e+00> : vector<32x128xf32>
    %26 = tpu.matmul %3, %25, %cst_22 {dimension_numbers = #tpu.dot_dimension_numbers<[1], [0], [0], [1], [0, 0, 1, 1], [], []>} : vector<32x32xf32>, vector<32x128xf32>, vector<32x128xf32> -> vector<32x128xf32>
    %27 = vector.broadcast %8 : vector<32x1xf32> to vector<32x128xf32>
    %28 = arith.addf %26, %27 : vector<32x128xf32>
    %cst_23 = arith.constant 0.000000e+00 : f32
    %29 = vector.broadcast %cst_23 : f32 to vector<32x128xf32>
    %30 = arith.maximumf %28, %29 : vector<32x128xf32>
    %31 = vector.broadcast %4 : vector<32x1xf32> to vector<32x128xf32>
    %32 = arith.mulf %30, %31 : vector<32x128xf32>
    %cst_24 = arith.constant dense<0.000000e+00> : vector<128xf32>
    %33 = vector.multi_reduction <add>, %32, %cst_24 [0] : vector<32x128xf32> to vector<128xf32>
    %34 = vector.shape_cast %33 : vector<128xf32> to vector<1x128xf32>
    %35 = vector.broadcast %9 : vector<1x1xf32> to vector<1x128xf32>
    %36 = arith.addf %34, %35 : vector<1x128xf32>
    %c0_25 = arith.constant 0 : index
    %c0_26 = arith.constant 0 : index
    %37 = vector.load %arg4[%c0_25, %c0_26] : memref<1x128xf32, #tpu.memory_space<vmem>>, vector<1x128xf32>
    tpu.vector_store %arg4[%c0_25, %c0_26], %36 {strides = array<i32>} : memref<1x128xf32, #tpu.memory_space<vmem>>, vector<1x128xf32>,
    return
  }
  func.func @transform_0(%arg0: i32) -> (i32, i32) {
    %c0_i32 = arith.constant 0 : i32
    %c0_i32_0 = arith.constant 0 : i32
    return %arg0, %c0_i32 : i32, i32
  }
  func.func @transform_1(%arg0: i32) -> (i32, i32) {
    %c0_i32 = arith.constant 0 : i32
    %c0_i32_0 = arith.constant 0 : i32
    %c0_i32_1 = arith.constant 0 : i32
    return %c0_i32, %c0_i32_0 : i32, i32
  }
  func.func @transform_2(%arg0: i32) -> (i32, i32) {
    %c0_i32 = arith.constant 0 : i32
    %c0_i32_0 = arith.constant 0 : i32
    %c0_i32_1 = arith.constant 0 : i32
    return %c0_i32, %c0_i32_0 : i32, i32
  }
  func.func @transform_3(%arg0: i32) -> (i32, i32) {
    %c0_i32 = arith.constant 0 : i32
    %c0_i32_0 = arith.constant 0 : i32
    return %c0_i32, %arg0 : i32, i32
  }
}

</mosaic_0001>

<bundles_post_ra>
// kernel: tpu_custom_call.1
= control target key start
LH: loop header
LB: loop body
LE: loop exit
PB: predicated region body
PF: predicated region fallthrough
CT: control target
= control target key end

     0   :  { %8 = vsyncpa [#allocation3], 0  ;;  %s1512_s0 = inlined_call_operand.vmem [shape: f32[256,8], index: 0, kind: input, shape index: {}]   ;;  %s1513_s1 = inlined_call_operand.vmem [shape: f32[160,32], index: 1, kind: input, shape index: {}]   ;;  %s1514_s2 = inlined_call_operand.vmem [shape: f32[129,1], index: 2, kind: input, shape index: {}]   ;;  %s1515_s3 = inlined_call_operand.hbm [shape: f32[1,256], index: 3, kind: output, shape index: {}]  }
   0x1   :  { %10 = vsyncpa [#allocation3 + $0x1], 0  ;;  %s1230_s12 = smov 0   ;;  %s1232_s13 = smov 0  }
   0x2   :  { %s1234_s14 = smov 0   ;;  %s1236_s15 = smov 0  }
   0x3 LB: > { %s864_s16 = sadd.s32 4294967295, %s1206_s15   ;;  %s865_s17 = sadd.s32 4294967294, %s1206_s15   ;;  %s1206_s15 = sphi %s1236_s15, %s1523_s15   ;;  %s1202_s14 = sphi %s1234_s14, %s1522_s14   ;;  %s1198_s13 = sphi %s1232_s13, %s1521_s13   ;;  %s1194_s12 = sphi %s1230_s12, %s1520_s12  }
   0x4   : > { %s1253_s18 = sadd.s32 1, %s1206_s15   ;;  %s91_s19 = sadd.s32 1, %s1202_s14 }
   0x5   : > { %s88_s20 = ssub.s32 %s1206_s15, %s1253_s18  ;;  %p101_p0 = scmp.ne.s32.totalorder %s1202_s14, %s1198_s13 }
   0x6   : > { %p89_p1 = scmp.eq.s32.totalorder %s88_s20, 0  ;;  %p102_p2 = scmp.eq.s32.totalorder %s864_s16, 1 }
   0x7   : > { %p107_p3 = scmp.ne.s32.totalorder %s1198_s13, %s1194_s12  ;;  %p108_p4 = scmp.eq.s32.totalorder %s865_s17, 1 }
   0x8   : > { %s1263_s21 = scalar_select %p89_p1, %s1202_s14, %s91_s19  }
   0x9   : > { %p1265_p5 = por %p102_p2, %p101_p0  ;;  %p1269_p6 = por %p108_p4, %p107_p3 }
   0xa   : > { %p868_p7 = scmp.ge.s32.totalorder %s1206_s15, 1  ;;  %p141_p8 = scmp.lt.s32.totalorder %s1206_s15, 3 }
   0xc   : > { %p142_p9 = pnand %p868_p7, %p141_p8 }
   0xd   : > { %s1275_s24 = sshll.u32 (!%p142_p9), %s864_s16, 4  ;;  %vm243_vm0 = vcmask (!%p142_p9), 64512   ;;  %v170_v0 = vld [vmem:[%s1513_s1] sm:$0xff] (!%p142_p9)  ;;  %v1208_v1 = vmov (!%p142_p9), 0   ;;  %v192_v3 = vld [vmem:[%s1514_s2 + $0x10] sm:$0xff] (!%p142_p9)  ;;  %v191_v4 = vld [vmem:[%s1514_s2 + $0x8] sm:$0xff] (!%p142_p9) }
   0xe   : > { %145 = sbr.rel (%p142_p9) target bundleno = 1028 (0x404), region = 32  ;;  %p165_p10 = scmp.lt.s32.totalorder (!%p142_p9), %s1275_s24, 31  ;;  %982 = vmatprep.mubr.msk.f32.mxu0 (!%p142_p9), %vm243_vm0, %v170_v0  ;;  %1142 = vset.pattern.permute.xlu0 (!%p142_p9), %v1208_v1  ;;  %v190_v2 = vld [vmem:[%s1514_s2] sm:$0xff] (!%p142_p9)  ;;  %v193_v5 = vld [vmem:[%s1514_s2 + $0x18] sm:$0xff] (!%p142_p9)  ;;  %vm1302_vm1 = vmpackc.low (!%p142_p9), %vm243_vm0, %vm243_vm0  ;;  %vm413_vm2 = vcmask (!%p142_p9), 261120  }
   0xf   : > { %225 = vperm.xlu0 (!%p142_p9), %1142, %v190_v2   ;;  %1143 = vset.pattern.permute.xlu1 (!%p142_p9), %v1208_v1  ;;  %v194_v7 = vld [vmem:[%s1514_s2 + $0x20] sm:$0xff] (!%p142_p9)  ;;  %v195_v13 = vld [vmem:[%s1514_s2 + $0x28] sm:$0xff] (!%p142_p9)  ;;  %v196_v15 = vld [vmem:[%s1514_s2 + $0x30] sm:$0xff] (!%p142_p9)  ;;  %s162_s6 = sand.u32 (!%p142_p9), 1, %s1198_s13   ;;  %s1470_s11 = scalar_lea.hbm (!%p142_p9), %s1515_s3, %s1275_s24 }
  0x10   : > { %235 = vperm.xlu1 (!%p142_p9), %1143, %v192_v3   ;;  %v197_v16 = vld [vmem:[%s1514_s2 + $0x38] sm:$0xff] (!%p142_p9)  ;;  %v198_v19 = vld [vmem:[%s1514_s2 + $0x40] sm:$0xff] (!%p142_p9)  ;;  %v199_v21 = vld [vmem:[%s1514_s2 + $0x48] sm:$0xff] (!%p142_p9)  ;;  %s163_s7 = scalar_lea.vmem (!%p142_p9), [#allocation2], %s162_s6  ;;  %s798_s17 = scalar_lea.sflag (!%p142_p9), [#allocation3], %s162_s6 }
  0x11   : > { %v200_v22 = vld [vmem:[%s1514_s2 + $0x50] sm:$0xff] (!%p142_p9)  ;;  %v201_v23 = vld [vmem:[%s1514_s2 + $0x58] sm:$0xff] (!%p142_p9)  ;;  %v202_v26 = vld [vmem:[%s1514_s2 + $0x60] sm:$0xff] (!%p142_p9)  ;;  %s810_s8 = sshll.u32 (!%p142_p9), %s163_s7, 4  ;;  %s1209_s20 = smov (!%p142_p9), [#allocation2]   ;;  %s1472_s8 = int_to_ptr.vmem [resolvable:$true] %s810_s8 }
  0x12   : > { %v203_v28 = vld [vmem:[%s1514_s2 + $0x68] sm:$0xff] (!%p142_p9)  ;;  %v204_v29 = vld [vmem:[%s1514_s2 + $0x70] sm:$0xff] (!%p142_p9)  ;;  %v205_v30 = vld [vmem:[%s1514_s2 + $0x78] sm:$0xff] (!%p142_p9)  ;;  %s1144_s19 = scalar_lea.vmem (!%p142_p9), %s1472_s8, 16  ;;  %s1148_s25 = sshll.u32 (!%p142_p9), %s1209_s20, 4  ;;  %s1149_s25 = int_to_ptr.vmem [resolvable:$false] %s1148_s25 }
  0x13   : > { %230 = vperm.xlu0 (!%p142_p9), %1142, %v191_v4   ;;  %v186_v33 = vld [vmem:[%s1513_s1 + $0x80] sm:$0xff] (!%p142_p9)  ;;  %v187_v35 = vld [vmem:[%s1513_s1 + $0x88] sm:$0xff] (!%p142_p9)  ;;  %v188_v36 = vld [vmem:[%s1513_s1 + $0x90] sm:$0xff] (!%p142_p9)  ;;  %p1145_p11 = scmp.ne.s32.totalorder (!%p142_p9), %s1472_s8, %s1144_s19  ;;  %p1151_p0 = scmp.lt.s32.totalorder (!%p142_p9), %s1472_s8, %s1149_s25 }
  0x14   : > { %240 = vperm.xlu1 (!%p142_p9), %1143, %v193_v5   ;;  %v189_v37 = vld [vmem:[%s1513_s1 + $0x98] sm:$0xff] (!%p142_p9)  ;;  %v206_v40 = vld [vmem:[%s1514_s2 + $0x80] sm:$0x1] (!%p142_p9)  ;;  %v171_v48 = vld [vmem:[%s1513_s1 + $0x8] sm:$0xff] (!%p142_p9) }
  0x15   : > { %s166_s4 = scalar_select %p165_p10, %s1275_s24, 31  ;;  %v172_v49 = vld [vmem:[%s1513_s1 + $0x10] sm:$0xff]  ;;  %v173_v50 = vld [vmem:[%s1513_s1 + $0x18] sm:$0xff]  ;;  %v174_v51 = vld [vmem:[%s1513_s1 + $0x20] sm:$0xff] }
  0x16   : > { %996 = vmatprep.mubr.msk.f32.mxu1 %vm413_vm2, %v174_v51  ;;  %v175_v6 = vld [vmem:[%s1513_s1 + $0x28] sm:$0xff]  ;;  %v184_v51 = vld [vmem:[%s1513_s1 + $0x70] sm:$0xff]  ;;  %p1146_p12 = pnand %p1145_p11, %p1265_p5 }
  0x17   : > { %s870_s9 = sshll.u32 %s166_s4, 3  ;;  %395 = vperm.xlu0 %1142, %v194_v7   ;;  %v176_v7 = vld [vmem:[%s1513_s1 + $0x30] sm:$0xff] }
  0x18   : > { %s1298_s16 = scalar_lea.vmem %s1512_s0, %s870_s9  ;;  %400 = vperm.xlu1 %1143, %v195_v13   ;;  %p1147_p13 = pneg %p1146_p12 }
  0x19   : > { %v207_v8 = vld [vmem:[%s1298_s16] sm:$0xff]  ;;  %v208_v9 = vld [vmem:[%s1298_s16 + $0x8] sm:$0xff]  ;;  %v209_v10 = vld [vmem:[%s1298_s16 + $0x10] sm:$0xff] }
  0x1a   : > { %v1030_v11 = vpack.c.bf16 %v208_v9, %v207_v8  ;;  %v210_v12 = vld [vmem:[%s1298_s16 + $0x18] sm:$0xff]  ;;  %v211_v17 = vld [vmem:[%s1298_s16 + $0x20] sm:$0xff]  ;;  %v212_v18 = vld [vmem:[%s1298_s16 + $0x28] sm:$0xff] }
  0x1b   : > { %v1036_v14 = vpack.c.bf16 %v210_v12, %v209_v10  ;;  %405 = vperm.xlu0 %1142, %v196_v15   ;;  %v1042_v20 = vpack.c.bf16 %v212_v18, %v211_v17  ;;  %v213_v24 = vld [vmem:[%s1298_s16 + $0x30] sm:$0xff]  ;;  %v214_v25 = vld [vmem:[%s1298_s16 + $0x38] sm:$0xff]  ;;  %v215_v31 = vld [vmem:[%s1298_s16 + $0x40] sm:$0xff] }
  0x1c   : > { %1032 = vmatprep.subr.msk.bf16.mxu0 %vm1302_vm1, %v1030_v11  ;;  %410 = vperm.xlu1 %1143, %v197_v16   ;;  %v1048_v27 = vpack.c.bf16 %v214_v25, %v213_v24  ;;  %v216_v32 = vld [vmem:[%s1298_s16 + $0x48] sm:$0xff]  ;;  %v217_v38 = vld [vmem:[%s1298_s16 + $0x50] sm:$0xff]  ;;  %v218_v39 = vld [vmem:[%s1298_s16 + $0x58] sm:$0xff] }
  0x1d   : > { %1035 = vmatpush3.bf16.xpose.msk.msra.mxu0 %vm1302_vm1, %v1030_v11  ;;  %v1054_v34 = vpack.c.bf16 %v216_v32, %v215_v31  ;;  %v1060_v41 = vpack.c.bf16 %v218_v39, %v217_v38  ;;  %v219_v42 = vld [vmem:[%s1298_s16 + $0x60] sm:$0xff]  ;;  %v220_v43 = vld [vmem:[%s1298_s16 + $0x68] sm:$0xff]  ;;  %v221_v45 = vld [vmem:[%s1298_s16 + $0x70] sm:$0xff] }
  0x1e   : > { %1038 = vmatprep.subr.msk.bf16.mxu0 %vm1302_vm1, %v1036_v14  ;;  %v1066_v44 = vpack.c.bf16 %v220_v43, %v219_v42  ;;  %v222_v46 = vld [vmem:[%s1298_s16 + $0x78] sm:$0xff]  ;;  %v178_v9 = vld [vmem:[%s1513_s1 + $0x40] sm:$0xff]  ;;  %s1150_s16 = scalar_lea.vmem %s1149_s25, 32 }
  0x1f   : > { %517 = vperm.xlu0 %1142, %v198_v19   ;;  %v1072_v47 = vpack.c.bf16 %v222_v46, %v221_v45  ;;  %v177_v8 = vld [vmem:[%s1513_s1 + $0x38] sm:$0xff]  ;;  %v182_v31 = vld [vmem:[%s1513_s1 + $0x60] sm:$0xff]  ;;  %p1152_p1 = scmp.lt.s32.totalorder %s1150_s16, %s1144_s19 }
  0x20   : > { %522 = vperm.xlu1 %1143, %v199_v21  }
  0x21   : > { %p1153_p2 = por %p1152_p1, %p1151_p0 }
  0x23   : > { %527 = vperm.xlu0 %1142, %v200_v22   ;;  %p1154_p3 = pnand %p1153_p2, %p1147_p13 }
  0x24   : > { %532 = vperm.xlu1 %1143, %v201_v23  }
  0x25   : > { %1041 = vmatpush3.bf16.xpose.msk.msra.mxu0 %vm1302_vm1, %v1036_v14 }
  0x26   : > { %1044 = vmatprep.subr.msk.bf16.mxu0 %vm1302_vm1, %v1042_v20 }
  0x27   : > { %638 = vperm.xlu0 %1142, %v202_v26  }
  0x28   : > { %643 = vperm.xlu1 %1143, %v203_v28   ;;  %v179_v28 = vld [vmem:[%s1513_s1 + $0x48] sm:$0xff] }
  0x2b   : > { %648 = vperm.xlu0 %1142, %v204_v29   ;;  %v180_v29 = vld [vmem:[%s1513_s1 + $0x50] sm:$0xff] }
  0x2c   : > { %653 = vperm.xlu1 %1143, %v205_v30   ;;  %v181_v30 = vld [vmem:[%s1513_s1 + $0x58] sm:$0xff] }
  0x2d   : > { %1047 = vmatpush3.bf16.xpose.msk.msra.mxu0 %vm1302_vm1, %v1042_v20 }
  0x2e   : > { %1050 = vmatprep.subr.msk.bf16.mxu0 %vm1302_vm1, %v1048_v27 }
  0x2f   : > { %759 = vperm.xlu0 %1142, %v186_v33  }
  0x30   : > { %764 = vperm.xlu1 %1143, %v187_v35  }
  0x33   : > { %769 = vperm.xlu0 %1142, %v188_v36  }
  0x34   : > { %774 = vperm.xlu1 %1143, %v189_v37  }
  0x35   : > { %1053 = vmatpush3.bf16.xpose.msk.msra.mxu0 %vm1302_vm1, %v1048_v27 }
  0x36   : > { %1056 = vmatprep.subr.msk.bf16.mxu0 %vm1302_vm1, %v1054_v34 }
  0x37   : > { %792 = vperm.xlu0 %1142, %v206_v40  }
  0x3d   : > { %1059 = vmatpush3.bf16.xpose.msk.msra.mxu0 %vm1302_vm1, %v1054_v34 }
  0x3e   : > { %1062 = vmatprep.subr.msk.bf16.mxu0 %vm1302_vm1, %v1060_v41 }
  0x45   : > { %1065 = vmatpush3.bf16.xpose.msk.msra.mxu0 %vm1302_vm1, %v1060_v41 }
  0x46   : > { %1068 = vmatprep.subr.msk.bf16.mxu0 %vm1302_vm1, %v1066_v44 }
  0x4d   : > { %1071 = vmatpush3.bf16.xpose.msk.msra.mxu0 %vm1302_vm1, %v1066_v44 }
  0x4e   : > { %1074 = vmatprep.subr.msk.bf16.mxu0 %vm1302_vm1, %v1072_v47 }
  0x55   : > { %1077 = vmatpush3.bf16.xpose.msk.msra.mxu0 %vm1302_vm1, %v1072_v47 }
  0x5c   : > { %983 = vmatmul.mubr.msk.f32.vlgmr.msra.gmra.mrb[0].mxu0 %vm243_vm0, %v171_v48 }
  0x5d   : > { %985 = vmatprep.mubr.msk.f32.mxu0 %vm243_vm0, %v172_v49 }
  0x60   : > { %986 = vmatmul.mubr.msk.f32.gmra.mrb[2].mxu0 %vm243_vm0, %v173_v50  ;;  %v183_v50 = vld [vmem:[%s1513_s1 + $0x68] sm:$0xff] }
  0x8e   : > { %v226_v52 = vpop.permute.xlu0 %225 }
  0x8f   : > { %v236_v53 = vpop.permute.xlu1 %235 }
  0x92   : > { %v231_v54 = vpop.permute.xlu0 %230 }
  0x93   : > { %v241_v60 = vpop.permute.xlu1 %240 }
  0x96   : > { %v396_v11 = vpop.permute.xlu0 %395 }
  0x97   : > { %v401_v10 = vpop.permute.xlu1 %400 }
  0x9a   : > { %v406_v20 = vpop.permute.xlu0 %405 }
  0x9b   : > { %v411_v17 = vpop.permute.xlu1 %410 }
  0x9e   : > { %v518_v33 = vpop.permute.xlu0 %517 }
  0x9f   : > { %v523_v32 = vpop.permute.xlu1 %522 }
  0xa2   : > { %v528_v42 = vpop.permute.xlu0 %527 }
  0xa3   : > { %v533_v39 = vpop.permute.xlu1 %532 }
 0x12f   : > { %v984_v55 = vpop.f32.mrb[0].mxu0 }
 0x130   : > { %v376_v56 = vadd.f32 %v984_v55, %v231_v54  ;;  %v370_v57 = vpop.f32.mrb[1].mxu0  ;;  %v644_v54 = vpop.permute.xlu1 %643 }
 0x131   : > { %v371_v58 = vadd.f32 %v370_v57, %v226_v52  ;;  %v185_v52 = vld [vmem:[%s1513_s1 + $0x78] sm:$0xff] }
 0x132   : > { %v390_v59 = vmax.f32 %v376_v56, 0.0 }
 0x133   : > { %v389_v61 = vmax.f32 %v371_v58, 0.0  ;;  %v987_v62 = vpop.f32.mrb[2].mxu0 }
 0x134   : > { %v386_v63 = vadd.f32 %v987_v62, %v241_v60  ;;  %v380_v0 = vpop.f32.mrb[3].mxu0  ;;  %v654_v56 = vpop.permute.xlu1 %653 }
 0x135   : > { %v381_v1 = vadd.f32 %v380_v0, %v236_v53  ;;  %v1078_v2 = vpack.c.bf16 %v390_v59, %v389_v61  ;;  %v639_v53 = vpop.permute.xlu0 %638 }
 0x136   : > { %v392_v3 = vmax.f32 %v386_v63, 0.0 }
 0x137   : > { %v391_v4 = vmax.f32 %v381_v1, 0.0  ;;  %1079 = vmatprep.subr.bf16.mxu1 %v1078_v2 }
 0x138   : > { %1081 = vmatpush3.bf16.msra.mxu1 %v1078_v2  ;;  %v765_v63 = vpop.permute.xlu1 %764 }
 0x139   : > { %v1082_v5 = vpack.c.bf16 %v392_v3, %v391_v4  ;;  %v649_v55 = vpop.permute.xlu0 %648 }
 0x13b   : > { %1083 = vmatprep.subr.bf16.mxu1 %v1082_v5 }
 0x13c   : > { %1085 = vmatpush3.bf16.msra.mxu1 %v1082_v5 }
 0x13d   : > { %v760_v61 = vpop.permute.xlu0 %759 }
 0x13f   : > { %997 = vmatmul.mubr.msk.f32.vlgmr.msra.gmra.mrb[0].mxu1 %vm413_vm2, %v175_v6 }
 0x140   : > { %999 = vmatprep.mubr.msk.f32.mxu1 %vm413_vm2, %v176_v7 }
 0x143   : > { %1000 = vmatmul.mubr.msk.f32.gmra.mrb[2].mxu1 %vm413_vm2, %v177_v8 }
 0x144   : > { %1010 = vmatprep.mubr.msk.f32.mxu1 %vm413_vm2, %v178_v9 }
 0x212   : > { %v998_v12 = vpop.f32.mrb[0].mxu1 }
 0x213   : > { %v498_v13 = vadd.f32 %v998_v12, %v401_v10  ;;  %v492_v14 = vpop.f32.mrb[1].mxu1  ;;  %v770_v10 = vpop.permute.xlu0 %769 }
 0x214   : > { %v493_v15 = vadd.f32 %v492_v14, %v396_v11  ;;  %v775_v12 = vpop.permute.xlu1 %774 }
 0x215   : > { %v512_v16 = vmax.f32 %v498_v13, 0.0 }
 0x216   : > { %v511_v18 = vmax.f32 %v493_v15, 0.0  ;;  %v1001_v19 = vpop.f32.mrb[2].mxu1 }
 0x217   : > { %v508_v21 = vadd.f32 %v1001_v19, %v411_v17  ;;  %v502_v22 = vpop.f32.mrb[3].mxu1 }
 0x218   : > { %v1086_v23 = vpack.c.bf16 %v512_v16, %v511_v18  ;;  %v503_v24 = vadd.f32 %v502_v22, %v406_v20  ;;  %v793_v22 = vpop.permute.xlu0 %792 }
 0x219   : > { %v514_v25 = vmax.f32 %v508_v21, 0.0 }
 0x21a   : > { %v513_v26 = vmax.f32 %v503_v24, 0.0  ;;  %1087 = vmatprep.subr.bf16.mxu1 %v1086_v23 }
 0x21b   : > { %1089 = vmatpush3.bf16.msra.mxu1 %v1086_v23 }
 0x21c   : > { %v1090_v27 = vpack.c.bf16 %v514_v25, %v513_v26 }
 0x21e   : > { %1091 = vmatprep.subr.bf16.mxu1 %v1090_v27 }
 0x21f   : > { %1093 = vmatpush3.bf16.msra.mxu1 %v1090_v27 }
 0x222   : > { %1011 = vmatmul.mubr.msk.f32.vlgmr.msra.gmra.mrb[4].mxu1 %vm413_vm2, %v179_v28 }
 0x223   : > { %1013 = vmatprep.mubr.msk.f32.mxu1 %vm413_vm2, %v180_v29 }
 0x226   : > { %1014 = vmatmul.mubr.msk.f32.gmra.mrb[6].mxu1 %vm413_vm2, %v181_v30 }
 0x227   : > { %1024 = vmatprep.mubr.msk.f32.mxu1 %vm413_vm2, %v182_v31 }
 0x2f5   : > { %v1012_v34 = vpop.f32.mrb[4].mxu1 }
 0x2f6   : > { %v619_v35 = vadd.f32 %v1012_v34, %v523_v32  ;;  %v613_v36 = vpop.f32.mrb[5].mxu1 }
 0x2f7   : > { %v614_v37 = vadd.f32 %v613_v36, %v518_v33 }
 0x2f8   : > { %v633_v38 = vmax.f32 %v619_v35, 0.0 }
 0x2f9   : > { %v632_v40 = vmax.f32 %v614_v37, 0.0  ;;  %v1015_v41 = vpop.f32.mrb[6].mxu1 }
 0x2fa   : > { %v629_v43 = vadd.f32 %v1015_v41, %v533_v39  ;;  %v623_v44 = vpop.f32.mrb[7].mxu1 }
 0x2fb   : > { %v1094_v45 = vpack.c.bf16 %v633_v38, %v632_v40  ;;  %v624_v46 = vadd.f32 %v623_v44, %v528_v42 }
 0x2fc   : > { %v635_v47 = vmax.f32 %v629_v43, 0.0 }
 0x2fd   : > { %v634_v48 = vmax.f32 %v624_v46, 0.0  ;;  %1095 = vmatprep.subr.bf16.mxu1 %v1094_v45 }
 0x2fe   : > { %1097 = vmatpush3.bf16.msra.mxu1 %v1094_v45 }
 0x2ff   : > { %v1098_v49 = vpack.c.bf16 %v635_v47, %v634_v48 }
 0x301   : > { %1099 = vmatprep.subr.bf16.mxu1 %v1098_v49 }
 0x302   : > { %1101 = vmatpush3.bf16.msra.mxu1 %v1098_v49 }
 0x305   : > { %1025 = vmatmul.mubr.msk.f32.vlgmr.msra.gmra.mrb[8].mxu1 %vm413_vm2, %v183_v50 }
 0x306   : > { %1027 = vmatprep.mubr.msk.f32.mxu1 %vm413_vm2, %v184_v51 }
 0x309   : > { %1028 = vmatmul.mubr.msk.f32.gmra.mrb[10].mxu1 %vm413_vm2, %v185_v52 }
 0x3d8   : > { %v1026_v57 = vpop.f32.mrb[8].mxu1 }
 0x3d9   : > { %v740_v58 = vadd.f32 %v1026_v57, %v644_v54  ;;  %v734_v59 = vpop.f32.mrb[9].mxu1 }
 0x3da   : > { %v735_v60 = vadd.f32 %v734_v59, %v639_v53 }
 0x3db   : > { %v754_v62 = vmax.f32 %v740_v58, 0.0 }
 0x3dc   : > { %v753_v0 = vmax.f32 %v735_v60, 0.0  ;;  %v1029_v1 = vpop.f32.mrb[10].mxu1 }
 0x3dd   : > { %v778_v2 = vmul.f32 %v765_v63, %v754_v62  ;;  %v750_v3 = vadd.f32 %v1029_v1, %v654_v56  ;;  %v744_v4 = vpop.f32.mrb[11].mxu1 }
 0x3de   : > { %v777_v5 = vmul.f32 %v760_v61, %v753_v0  ;;  %v745_v6 = vadd.f32 %v744_v4, %v649_v55 }
 0x3df   : > { %v756_v8 = vmax.f32 %v750_v3, 0.0 }
 0x3e0   : > { %v781_v7 = vadd.f32 %v778_v2, %v777_v5  ;;  %v755_v9 = vmax.f32 %v745_v6, 0.0 }
 0x3e1   : > { %v780_v13 = vmul.f32 %v775_v12, %v756_v8 }
 0x3e2   : > { %v779_v11 = vmul.f32 %v770_v10, %v755_v9 }
 0x3e4   : > { %v782_v14 = vadd.f32 %v781_v7, %v779_v11 }
 0x3e6   : > { %v783_v15 = vadd.f32 %v782_v14, %v780_v13 }
 0x3e8   : > { %v784_v16 = vrot.slane %v783_v15, 4 }
 0x3ea   : > { %v785_v17 = vadd.f32 %v784_v16, %v783_v15 }
 0x3ec   : > { %v786_v18 = vrot.slane %v785_v17, 2 }
 0x3ee   : > { %v787_v19 = vadd.f32 %v786_v18, %v785_v17 }
 0x3f0   : > { %v788_v20 = vrot.slane %v787_v19, 1 }
 0x3f2   : > { %v789_v21 = vadd.f32 %v788_v20, %v787_v19 }
 0x3f4   : > { %v795_v23 = vadd.f32 %v793_v22, %v789_v21 }
 0x3f6   : > { %796 = vst [vmem:[%s163_s7] sm:$0x1] %v795_v23 }
 0x3f7   : > { %1157 = shalt.err (!%p1154_p3)
}
 0x3f8   : > { %s1158_s24 = scalar_lea.hbm %s1470_s11, 16  ;;  %s1162_s28 = scalar_lea.hbm %s1515_s3, 32 }
 0x3f9   : > { %p1159_p4 = scmp.ne.s32.totalorder %s1470_s11, %s1158_s24  ;;  %p1163_p9 = scmp.lt.u32.totalorder %s1470_s11, %s1515_s3 }
 0x3fa   : > { %p1164_p10 = scmp.lt.u32.totalorder %s1162_s28, %s1158_s24  ;;  %p1166_p12 = scmp.lt.u32.totalorder %s1158_s24, %s1470_s11 }
 0x3fb   : > { %p1160_p7 = pnand %p1159_p4, %p1265_p5 }
 0x3fc   : > { %p1165_p11 = por %p1164_p10, %p1163_p9 }
 0x3fd   : > { %p1161_p8 = pneg %p1160_p7 }
 0x3fe   : > { %p1167_p13 = por %p1166_p12, %p1165_p11 }
 0x400   : > { %p1168_p0 = pnand %p1167_p13, %p1161_p8 }
 0x402   : > { %1171 = shalt.err (!%p1168_p0)
}
 0x403   : > { %1102 = dma.vmem_to_hbm [thread:$0]  (%p1265_p5), %s1472_s8, 16, %s1470_s11, %s798_s17  }
 0x404 PF: > { %p1108_p1 = scmp.ge.s32.totalorder %s1206_s15, 2  ;;  %s822_s4 = sand.u32 1, %s1194_s12  }
 0x405   : > { %s823_s5 = scalar_lea.sflag [#allocation3], %s822_s4 }
 0x406   : > { %p1105_p2 = pnand %p1108_p1, %p1269_p6 }
 0x408   : > { %1189 = dma.done.wait (!%p1105_p2), %s823_s5, 16  }
 0x409   : > { %1191 = vsyncadd (!%p1105_p2), %s823_s5, 4294967280  ;;  %p13_p3 = scmp.ge.s32.totalorder %s1253_s18, 4   ;;  %s1520_s12 = smov %s1198_s13 }
 0x40a   : > { %s1521_s13 = smov %s1202_s14  ;;  %s1522_s14 = smov %s1263_s21 }
 0x40b   : > { %s1523_s15 = smov %s1253_s18  ;;  %15 = sbr.rel (!%p13_p3) target bundleno = 3 (0x3), region = 67 }
 0x412   :  { %827 = vsyncpa [#allocation3], 1 }
 0x413   :  { %829 = vsyncpa [#allocation3 + $0x1], 1 }

</bundles_post_ra>
